<compile_context>
chip_gen: v7x
topology: tpu7x:2x2x1
jax: 0.10.0
libtpu: 0.0.40
codegen_flags: <defaults>
</compile_context>

<pallas_src>
import jax
import jax.numpy as jnp
from jax.experimental import pallas as pl
from jax.experimental.pallas import tpu as pltpu


def _dual_pointwise_conv_kernel(x_ref, w1_ref, b1_ref, w2_ref, b2_ref,
                                o1_ref, o2_ref):
    # x_ref : (C, HW)    input channels x flattened pixels (pixels on lanes)
    # w1_ref: (O1, C)    conv1 weight (1x1 kernel squeezed)
    # b1_ref: (O1, 1)    conv1 bias, broadcast along lanes
    # w2_ref: (O2, C)    conv2 weight
    # b2_ref: (O2, 1)    conv2 bias
    # o1_ref: (O1, HW)   conv1 output tile (lane-dense)
    # o2_ref: (O2, HW)   conv2 output tile (lane-dense)
    x = x_ref[...]
    o1_ref[...] = (
        jnp.dot(w1_ref[...], x, preferred_element_type=jnp.float32) + b1_ref[...]
    ).astype(o1_ref.dtype)
    o2_ref[...] = (
        jnp.dot(w2_ref[...], x, preferred_element_type=jnp.float32) + b2_ref[...]
    ).astype(o2_ref.dtype)


def dummy_module_forward(x_nchw, w1, b1, w2, b2):
    """Equivalent of DummyModule.forward: returns (conv1(x), conv2(x)).

    x_nchw : (N, C, H, W) float32
    w1     : (O1, C)  conv1 weight (kernel_size=1 squeezed)
    b1     : (O1,)
    w2     : (O2, C)  conv2 weight
    b2     : (O2,)
    """
    N, C, H, W = x_nchw.shape
    O1 = w1.shape[0]
    O2 = w2.shape[0]
    HW = H * W

    # Free reshape: only the minor two dims are flattened, no relayout.
    x3d = x_nchw.reshape(N, C, HW)
    b1c = b1.reshape(O1, 1)
    b2c = b2.reshape(O2, 1)

    cost = pl.CostEstimate(
        flops=2 * (O1 + O2) * C * N * HW,
        bytes_accessed=4 * (N * C * HW + (O1 + O2) * C + (O1 + O2)
                            + N * (O1 + O2) * HW),
        transcendentals=0,
    )

    out1, out2 = pl.pallas_call(
        _dual_pointwise_conv_kernel,
        out_shape=(
            jax.ShapeDtypeStruct((N, O1, HW), jnp.float32),
            jax.ShapeDtypeStruct((N, O2, HW), jnp.float32),
        ),
        grid=(N,),
        in_specs=[
            # Batch dim squeezed out of the kernel view; (C, HW) are the full
            # array extents on the minor two dims, so the (8,128) rule is met.
            pl.BlockSpec((None, C, HW), lambda n: (n, 0, 0)),
            # Tiny weights/biases: constant index_map -> stay VMEM-resident.
            pl.BlockSpec((O1, C), lambda n: (0, 0)),
            pl.BlockSpec((O1, 1), lambda n: (0, 0)),
            pl.BlockSpec((O2, C), lambda n: (0, 0)),
            pl.BlockSpec((O2, 1), lambda n: (0, 0)),
        ],
        out_specs=(
            pl.BlockSpec((None, O1, HW), lambda n: (n, 0, 0)),
            pl.BlockSpec((None, O2, HW), lambda n: (n, 0, 0)),
        ),
        compiler_params=pltpu.CompilerParams(
            dimension_semantics=("parallel",),
        ),
        cost_estimate=cost,
    )(x3d, w1, b1c, w2, b2c)

    # Free reshapes back to NCHW (minor dims only).
    return out1.reshape(N, O1, H, W), out2.reshape(N, O2, H, W)


if __name__ == "__main__":
    num_classes = [1, 8]
    num_channels = 3
    N, H, W = 2, 16, 16

    key = jax.random.PRNGKey(0)
    kx, kw1, kb1, kw2, kb2 = jax.random.split(key, 5)

    x = jax.random.normal(kx, (N, num_channels, H, W), dtype=jnp.float32)
    # Deterministic "init": mimic nn.Conv2d parameter shapes (kernel_size=1).
    w1 = jax.random.normal(kw1, (num_classes[0], num_channels), dtype=jnp.float32) * 0.1
    b1 = jax.random.normal(kb1, (num_classes[0],), dtype=jnp.float32) * 0.1
    w2 = jax.random.normal(kw2, (num_classes[1], num_channels), dtype=jnp.float32) * 0.1
    b2 = jax.random.normal(kb2, (num_classes[1],), dtype=jnp.float32) * 0.1

    out1, out2 = jax.jit(dummy_module_forward)(x, w1, b1, w2, b2)
    jax.block_until_ready((out1, out2))

    # Reference check against plain-JAX 1x1 conv semantics.
    ref1 = jnp.einsum('nchw,oc->nohw', x, w1) + b1[None, :, None, None]
    ref2 = jnp.einsum('nchw,oc->nohw', x, w2) + b2[None, :, None, None]
    assert out1.shape == (N, num_classes[0], H, W)
    assert out2.shape == (N, num_classes[1], H, W)
    assert jnp.allclose(out1, ref1, atol=1e-5)
    assert jnp.allclose(out2, ref2, atol=1e-5)

    print("KERNEL_OK")
</pallas_src>

<mosaic_0001>
module attributes {stable_mosaic.version = 11 : i64} {
  func.func @_dual_pointwise_conv_kernel(%arg0: i32, %arg1: memref<1x3x256xf32, #tpu.memory_space<vmem>>, %arg2: memref<1x3xf32, #tpu.memory_space<vmem>>, %arg3: memref<1x1xf32, #tpu.memory_space<vmem>>, %arg4: memref<8x3xf32, #tpu.memory_space<vmem>>, %arg5: memref<8x1xf32, #tpu.memory_space<vmem>>, %arg6: memref<1x1x256xf32, #tpu.memory_space<vmem>>, %arg7: memref<1x8x256xf32, #tpu.memory_space<vmem>>) attributes {dimension_semantics = [#tpu.dimension_semantics<parallel>], iteration_bounds = array<i64: 2>, scalar_prefetch = 0 : i64, scratch_operands = 0 : i64, tpu.core_type = #tpu.core_type<tc>, window_params = [{transform_indices = @transform_0, window_bounds = array<i64: 1, 3, 256>}, {pipeline_mode = #tpu.pipeline_mode<synchronous>, transform_indices = @transform_1, window_bounds = array<i64: 1, 3>}, {pipeline_mode = #tpu.pipeline_mode<synchronous>, transform_indices = @transform_2, window_bounds = array<i64: 1, 1>}, {pipeline_mode = #tpu.pipeline_mode<synchronous>, transform_indices = @transform_3, window_bounds = array<i64: 8, 3>}, {pipeline_mode = #tpu.pipeline_mode<synchronous>, transform_indices = @transform_4, window_bounds = array<i64: 8, 1>}, {transform_indices = @transform_5, window_bounds = array<i64: 1, 1, 256>}, {transform_indices = @transform_6, window_bounds = array<i64: 1, 8, 256>}]} {
    %c0 = arith.constant 0 : index
    %c0_0 = arith.constant 0 : index
    %c0_1 = arith.constant 0 : index
    %0 = vector.load %arg1[%c0, %c0_0, %c0_1] : memref<1x3x256xf32, #tpu.memory_space<vmem>>, vector<1x3x256xf32>
    %1 = vector.shape_cast %0 : vector<1x3x256xf32> to vector<3x256xf32>
    %c0_2 = arith.constant 0 : index
    %c0_3 = arith.constant 0 : index
    %2 = vector.load %arg2[%c0_2, %c0_3] : memref<1x3xf32, #tpu.memory_space<vmem>>, vector<1x3xf32>
    %cst = arith.constant dense<0.000000e+00> : vector<1x256xf32>
    %3 = tpu.matmul %2, %1, %cst {dimension_numbers = #tpu.dot_dimension_numbers<[1], [0], [0], [1], [0, 0, 1, 1], [], []>} : vector<1x3xf32>, vector<3x256xf32>, vector<1x256xf32> -> vector<1x256xf32>
    %c0_4 = arith.constant 0 : index
    %c0_5 = arith.constant 0 : index
    %4 = vector.load %arg3[%c0_4, %c0_5] : memref<1x1xf32, #tpu.memory_space<vmem>>, vector<1x1xf32>
    %5 = vector.broadcast %4 : vector<1x1xf32> to vector<1x256xf32>
    %6 = arith.addf %3, %5 : vector<1x256xf32>
    %c0_6 = arith.constant 0 : index
    %c0_7 = arith.constant 0 : index
    %c0_8 = arith.constant 0 : index
    %7 = vector.load %arg6[%c0_6, %c0_7, %c0_8] : memref<1x1x256xf32, #tpu.memory_space<vmem>>, vector<1x1x256xf32>
    %8 = vector.shape_cast %7 : vector<1x1x256xf32> to vector<1x256xf32>
    %9 = vector.shape_cast %6 : vector<1x256xf32> to vector<1x1x256xf32>
    tpu.vector_store %arg6[%c0_6, %c0_7, %c0_8], %9 {strides = array<i32>} : memref<1x1x256xf32, #tpu.memory_space<vmem>>, vector<1x1x256xf32>,
    %c0_9 = arith.constant 0 : index
    %c0_10 = arith.constant 0 : index
    %10 = vector.load %arg4[%c0_9, %c0_10] : memref<8x3xf32, #tpu.memory_space<vmem>>, vector<8x3xf32>
    %cst_11 = arith.constant dense<0.000000e+00> : vector<8x256xf32>
    %11 = tpu.matmul %10, %1, %cst_11 {dimension_numbers = #tpu.dot_dimension_numbers<[1], [0], [0], [1], [0, 0, 1, 1], [], []>} : vector<8x3xf32>, vector<3x256xf32>, vector<8x256xf32> -> vector<8x256xf32>
    %c0_12 = arith.constant 0 : index
    %c0_13 = arith.constant 0 : index
    %12 = vector.load %arg5[%c0_12, %c0_13] : memref<8x1xf32, #tpu.memory_space<vmem>>, vector<8x1xf32>
    %13 = vector.broadcast %12 : vector<8x1xf32> to vector<8x256xf32>
    %14 = arith.addf %11, %13 : vector<8x256xf32>
    %c0_14 = arith.constant 0 : index
    %c0_15 = arith.constant 0 : index
    %c0_16 = arith.constant 0 : index
    %15 = vector.load %arg7[%c0_14, %c0_15, %c0_16] : memref<1x8x256xf32, #tpu.memory_space<vmem>>, vector<1x8x256xf32>
    %16 = vector.shape_cast %15 : vector<1x8x256xf32> to vector<8x256xf32>
    %17 = vector.shape_cast %14 : vector<8x256xf32> to vector<1x8x256xf32>
    tpu.vector_store %arg7[%c0_14, %c0_15, %c0_16], %17 {strides = array<i32>} : memref<1x8x256xf32, #tpu.memory_space<vmem>>, vector<1x8x256xf32>,
    return
  }
  func.func @transform_0(%arg0: i32) -> (i32, i32, i32) {
    %c0_i32 = arith.constant 0 : i32
    %c0_i32_0 = arith.constant 0 : i32
    %c0_i32_1 = arith.constant 0 : i32
    return %arg0, %c0_i32, %c0_i32_0 : i32, i32, i32
  }
  func.func @transform_1(%arg0: i32) -> (i32, i32) {
    %c0_i32 = arith.constant 0 : i32
    %c0_i32_0 = arith.constant 0 : i32
    %c0_i32_1 = arith.constant 0 : i32
    return %c0_i32, %c0_i32_0 : i32, i32
  }
  func.func @transform_2(%arg0: i32) -> (i32, i32) {
    %c0_i32 = arith.constant 0 : i32
    %c0_i32_0 = arith.constant 0 : i32
    %c0_i32_1 = arith.constant 0 : i32
    return %c0_i32, %c0_i32_0 : i32, i32
  }
  func.func @transform_3(%arg0: i32) -> (i32, i32) {
    %c0_i32 = arith.constant 0 : i32
    %c0_i32_0 = arith.constant 0 : i32
    %c0_i32_1 = arith.constant 0 : i32
    return %c0_i32, %c0_i32_0 : i32, i32
  }
  func.func @transform_4(%arg0: i32) -> (i32, i32) {
    %c0_i32 = arith.constant 0 : i32
    %c0_i32_0 = arith.constant 0 : i32
    %c0_i32_1 = arith.constant 0 : i32
    return %c0_i32, %c0_i32_0 : i32, i32
  }
  func.func @transform_5(%arg0: i32) -> (i32, i32, i32) {
    %c0_i32 = arith.constant 0 : i32
    %c0_i32_0 = arith.constant 0 : i32
    %c0_i32_1 = arith.constant 0 : i32
    return %arg0, %c0_i32, %c0_i32_0 : i32, i32, i32
  }
  func.func @transform_6(%arg0: i32) -> (i32, i32, i32) {
    %c0_i32 = arith.constant 0 : i32
    %c0_i32_0 = arith.constant 0 : i32
    %c0_i32_1 = arith.constant 0 : i32
    return %arg0, %c0_i32, %c0_i32_0 : i32, i32, i32
  }
}

</mosaic_0001>

<bundles_post_ra>
// kernel: dummy_module_forward.1
= control target key start
LH: loop header
LB: loop body
LE: loop exit
PB: predicated region body
PF: predicated region fallthrough
CT: control target
= control target key end

     0   :  { %s633_s23 = smov 0   ;;  %s667_s0 = inlined_call_operand.vmem [shape: f32[2,3,256], index: 0, kind: input, shape index: {}]   ;;  %s668_s1 = inlined_call_operand.vmem [shape: f32[1,3], index: 1, kind: input, shape index: {}]   ;;  %s669_s2 = inlined_call_operand.<no memory space> [shape: f32[1,1], index: 2, kind: input, shape index: {}]   ;;  %s670_s3 = inlined_call_operand.vmem [shape: f32[8,3], index: 3, kind: input, shape index: {}]   ;;  %s671_s4 = inlined_call_operand.vmem [shape: f32[8,1], index: 4, kind: input, shape index: {}]   ;;  %s672_s5 = inlined_call_operand.vmem [shape: f32[2,1,256], index: 5, kind: output, shape index: {0}]   ;;  %s673_s6 = inlined_call_operand.vmem [shape: f32[2,8,256], index: 6, kind: output, shape index: {1}]  }
   0x1   :  { %v12_v0 = vstv %s669_s2 }
   0x2   :  { %13 = vst [vmem:[#allocation2] sm:$0x1] %v12_v0 }
   0x3 LB: > { %s551_s24 = sadd.s32 4294967295, %s590_s23   ;;  %p555_p0 = scmp.ge.s32.totalorder %s590_s23, 1  ;;  %s590_s23 = sphi %s633_s23, %s19_s23  }
   0x4   : > { %p217_p1 = scmp.lt.s32.totalorder %s590_s23, 3 }
   0x6   : > { %p218_p2 = pnand %p555_p0, %p217_p1 }
   0x7   : > { %p251_p3 = scmp.lt.s32.totalorder (!%p218_p2), %s551_s24, 1  ;;  %v592_v1 = vmov (!%p218_p2), 0.0   ;;  %v593_v3 = vmov (!%p218_p2), 0   ;;  %v383_v4 = vld [vmem:[%s671_s4] sm:$0xff] (!%p218_p2)  ;;  %vm283_vm0 = vcmask (!%p218_p2), 1042432   ;;  %vm279_vm1 = vcmask (!%p218_p2), 23552  }
   0x8   : > { %221 = sbr.rel (%p218_p2) target bundleno = 245 (0xf5), region = 40  ;;  %352 = vmatprep.mubr.f32.mxu0 (!%p218_p2), %v592_v1  ;;  %456 = vmatprep.mubr.f32.mxu1 (!%p218_p2), %v592_v1  ;;  %v266_v7 = vld [vmem:[%s668_s1] sm:$0x1] (!%p218_p2)  ;;  %v273_v9 = vlaneseq (!%p218_p2)  ;;  %v594_v13 = vmov (!%p218_p2), 1966171168  }
   0x9   : > { %v267_v2 = vld [vmem:[#allocation2] sm:$0x1] (!%p218_p2)  ;;  %582 = vset.pattern.permute.xlu0 (!%p218_p2), %v593_v3  ;;  %v363_v14 = vunpack.c.l.s4 (!%p218_p2), %v594_v13 }
   0xa   : > { %270 = vperm.xlu0 (!%p218_p2), %582, %v267_v2   ;;  %v382_v8 = vld [vmem:[%s670_s3] sm:$0xff] (!%p218_p2)  ;;  %v274_v10 = vshrl.u32 (!%p218_p2), %v273_v9, 7  ;;  %vm379_vm2 = vcmp.lt.s32.totalorder (!%p218_p2), %v273_v9, 256 }
   0xb   : > { %v364_v17 = vunpack.c.0.s8 (!%p218_p2), %v363_v14 }
   0xc   : > { %v275_v12 = vsub.s32 (!%p218_p2), 0, %v274_v10 }
   0xd   : > { %v367_v25 = vsub.s32 (!%p218_p2), %v364_v17, %v274_v10 }
   0xe   : > { %386 = vperm.xlu0 (!%p218_p2), %582, %v383_v4  }
   0xf   : > { %s675_s24 = smov (!%p251_p3, %s551_s24), 1 }
  0x10   : > { %s569_s2 = sshll.u32 %s675_s24, 3  ;;  %s570_s10 = sshll.u32 %s675_s24, 4 }
  0x11   : > { %s255_s29 = scalar_lea.vmem %s667_s0, %s569_s2  ;;  %s264_s13 = scalar_lea.vmem %s673_s6, %s570_s10 }
  0x12   : > { %v265_v5 = vld [vmem:[%s255_s29] sm:$0x77]  ;;  %s558_s14 = sshll.u32 %s675_s24, 1 }
  0x13   : > { %v278_v6 = vcombine.high %v265_v5, %v265_v5  ;;  %s259_s17 = scalar_lea.vmem %s672_s5, %s558_s14 }
  0x15   : > { %561 = vmatprep.subr.msk.mxu0 %vm283_vm0, %v278_v6  ;;  %564 = vmatprep.subr.msk.mxu1 %vm283_vm0, %v278_v6 }
  0x16   : > { %562 = vmatpush1.msk.msra.mxu0 %vm283_vm0, %v265_v5  ;;  %565 = vmatpush1.msk.msra.mxu1 %vm283_vm0, %v265_v5 }
  0x17   : > { %563 = vmatmul.mubr.msk.f32.vlgmr.msra.gmra.mrb[0].mxu0 %vm279_vm1, %v266_v7  ;;  %566 = vmatmul.mubr.msk.f32.vlgmr.msra.gmra.mrb[0].mxu1 %vm279_vm1, %v382_v8 }
  0x89   : > { %v271_v11 = vpop.permute.xlu0 %270 }
  0x8a   : > { %v276_v15 = vrot.slane %v271_v11, %v275_v12 }
  0x8d   : > { %v387_v16 = vpop.permute.xlu0 %386 }
  0xea   : > { %v354_v18 = vpop.f32.mrb[0].mxu0  ;;  %v458_v19 = vpop.f32.mrb[0].mxu1 }
  0xeb   : > { %v355_v20 = vadd.f32 %v354_v18, %v276_v15  ;;  %v459_v21 = vadd.f32 %v458_v19, %v387_v16  ;;  %v356_v22 = vpop.f32.mrb[1].mxu0  ;;  %v460_v23 = vpop.f32.mrb[1].mxu1 }
  0xec   : > { %v357_v24 = vadd.f32 %v356_v22, %v276_v15  ;;  %v461_v26 = vadd.f32 %v460_v23, %v387_v16 }
  0xed   : > { %463 = vst [vmem:[%s264_s13] sm:$0xff] %v459_v21 }
  0xee   : > { %v361_v27 = vcombine.low %v355_v20, %v357_v24  ;;  %464 = vst [vmem:[%s264_s13 + $0x8] sm:$0xff] %v461_v26 }
  0xf0   : > { %v368_v28 = vrot.slane %v361_v27, %v367_v25 }
  0xf2   : > { %v375_v29 = vrot.slane %v368_v28, %v367_v25 }
  0xf4   : > { %381 = vst.msk [vmem:[%s259_s17] sm:$0x3] %vm379_vm2, %v375_v29 }
  0xf5 PF: > { %s19_s23 = sadd.s32 1, %s590_s23  }
  0xf6   : > { %p16_p4 = scmp.ge.s32.totalorder %s19_s23, 4  }
  0xf8   :  { %18 = sbr.rel (!%p16_p4) target bundleno = 3 (0x3), region = 82 }

</bundles_post_ra>
